<compile_context>
chip_gen: v6e
topology: v6e:2x2x1
jax: 0.10.0
libtpu: 0.0.40
codegen_flags: <defaults>
</compile_context>

<pallas_src>
import jax
import jax.numpy as jnp
from jax import lax
from jax.experimental import pallas as pl
from jax.experimental.pallas import tpu as pltpu

_F32 = 4
_BN_EPS = 1e-5


# ---------------------------------------------------------------------------
# Shared epilogue math: fold both training-mode BatchNorms into per-feature
# scale/shift (single pass: sum + sum-of-squares), then gate with sigmoid.
# BN stats are per-feature over the FULL batch, so blocks always carry all B rows.
# ---------------------------------------------------------------------------
def _bn_fold_gate(x2, m, xg, g1, g2, bsum):
    inv_b = jnp.float32(1.0 / m.shape[0])
    eps = jnp.float32(_BN_EPS)

    def scale_shift(v, gamma):
        s = jnp.sum(v, axis=0, keepdims=True)
        ss = jnp.sum(v * v, axis=0, keepdims=True)
        mean = s * inv_b
        var = jnp.maximum(ss * inv_b - mean * mean, jnp.float32(0.0))
        scale = gamma * lax.rsqrt(var + eps)
        return scale, mean * scale

    sc1, ms1 = scale_shift(m, g1)
    sc2, ms2 = scale_shift(x2, g2)
    # t = BN1(m) + BN2(x2) = m*sc1 + x2*sc2 + (beta1+beta2 - mean1*sc1 - mean2*sc2)
    t = m * sc1 + x2 * sc2 + (bsum - ms1 - ms2)
    return xg * jax.nn.sigmoid(t)


# ---------------------------------------------------------------------------
# Fused kernel: grid = (K tiles,).  Full feature row resident; at the last K step
# apply BN-fold + gate + row-wise L2 normalization and write the final output.
# ---------------------------------------------------------------------------
def _fused_kernel(xk_ref, w_ref, b_ref, m_ref, xg_ref, g1_ref, g2_ref, bsum_ref,
                  out_ref, acc_ref):
    k = pl.program_id(0)

    @pl.when(k == 0)
    def _():
        acc_ref[...] = jnp.zeros_like(acc_ref)

    # x[B, tk] contracted with W[D, tk] along dim 1 (== x @ W.T tile), f32 accumulation.
    acc_ref[...] += lax.dot_general(
        xk_ref[...], w_ref[...],
        dimension_numbers=(((1,), (1,)), ((), ())),
        preferred_element_type=jnp.float32)

    @pl.when(k == pl.num_programs(0) - 1)
    def _():
        x2 = acc_ref[...] + b_ref[...]
        m = m_ref[...].astype(jnp.float32)
        gated = _bn_fold_gate(x2, m, xg_ref[...].astype(jnp.float32),
                              g1_ref[...], g2_ref[...], bsum_ref[...])
        ssq = jnp.sum(gated * gated, axis=1, keepdims=True)
        inv = lax.rsqrt(jnp.maximum(ssq, jnp.float32(1e-24)))   # == 1/max(||g||, 1e-12)
        out_ref[...] = (gated * inv).astype(out_ref.dtype)


# ---------------------------------------------------------------------------
# Tiled gating kernel: grid = (feature tiles, K tiles), K innermost.
#   gated[:, n] = x[:, n] * sigmoid(BN1(mask)[:, n] + BN2(x@W.T+b)[:, n])
# ---------------------------------------------------------------------------
def _context_gating_kernel(xk_ref, w_ref, b_ref, m_ref, xg_ref, g1_ref, g2_ref, bsum_ref,
                           out_ref, acc_ref):
    k = pl.program_id(1)

    @pl.when(k == 0)
    def _():
        acc_ref[...] = jnp.zeros_like(acc_ref)

    acc_ref[...] += lax.dot_general(
        xk_ref[...], w_ref[...],
        dimension_numbers=(((1,), (1,)), ((), ())),
        preferred_element_type=jnp.float32)

    @pl.when(k == pl.num_programs(1) - 1)
    def _():
        x2 = acc_ref[...] + b_ref[...]
        m = m_ref[...].astype(jnp.float32)
        gated = _bn_fold_gate(x2, m, xg_ref[...].astype(jnp.float32),
                              g1_ref[...], g2_ref[...], bsum_ref[...])
        out_ref[...] = gated.astype(out_ref.dtype)


# ---------------------------------------------------------------------------
# Row-wise L2 normalize (F.normalize, dim=1, eps=1e-12); batch tiled, full row/block.
# ---------------------------------------------------------------------------
def _l2_normalize_kernel(g_ref, o_ref):
    g = g_ref[...].astype(jnp.float32)
    ssq = jnp.sum(g * g, axis=1, keepdims=True)
    inv = lax.rsqrt(jnp.maximum(ssq, jnp.float32(1e-24)))
    o_ref[...] = (g * inv).astype(o_ref.dtype)


# ---------------------------------------------------------------------------
# Tile pickers.
# ---------------------------------------------------------------------------
def _pick_k_tile(d, preferred=512):
    if d <= preferred:
        return d
    for t in (512, 384, 256, 128):
        if d % t == 0:
            return t
    return d


def _pick_feature_tile(d, b, budget=16 * 1024 * 1024):
    # Largest tile dividing d whose resident f32 working set (~7 copies of [B, tn]) fits.
    cands = ([d] if d <= 512 else []) + [t for t in (512, 384, 256, 128) if d % t == 0]
    if not cands:
        return d
    for t in cands:
        if 7 * b * t * _F32 <= budget:
            return t
    return cands[-1]


def _pick_batch_tile(b, preferred=128):
    if b <= preferred:
        return b
    for t in (128, 64, 32, 16, 8):
        if b % t == 0:
            return t
    return b


# ---------------------------------------------------------------------------
# Wrapper.
# ---------------------------------------------------------------------------
def gated_embedding_unit_reasoning(x, mask, params, *, matmul_dtype=jnp.bfloat16,
                                   allow_fused=True, feature_tile=None):
    """x, mask: [B, D] float32.  params: fc/bn parameters (PyTorch layout)."""
    B, D = x.shape
    mm_itemsize = jnp.dtype(matmul_dtype).itemsize

    w = params["fc_w"].astype(matmul_dtype)                  # [D_out, D_in], NOT transposed
    x_mm = x.astype(matmul_dtype)                            # MXU operand
    b = params["fc_b"].reshape(1, D).astype(jnp.float32)
    g1 = params["bn1_w"].reshape(1, D).astype(jnp.float32)
    g2 = params["bn2_w"].reshape(1, D).astype(jnp.float32)
    beta_sum = (params["bn1_b"] + params["bn2_b"]).reshape(1, D).astype(jnp.float32)

    tk = feature_tile if feature_tile is not None else _pick_k_tile(D)
    k_tiles = D // tk

    cost = pl.CostEstimate(
        flops=2 * B * D * D,
        transcendentals=B * D,
        bytes_accessed=(D * D * mm_itemsize + B * D * mm_itemsize
                        + 3 * B * D * _F32 + 4 * D * _F32),
    )

    # Conservative VMEM estimate for the fused (full-feature-row resident) path.
    fused_vmem = (7 * B * D * _F32                      # acc + mask/x/out (double-buffered)
                  + 2 * (B + D) * tk * mm_itemsize      # streamed matmul operands
                  + 8 * D * _F32)                       # per-feature parameter rows
    use_fused = (allow_fused and feature_tile is None and D % tk == 0
                 and fused_vmem <= 24 * 1024 * 1024)

    if use_fused:
        return pl.pallas_call(
            _fused_kernel,
            out_shape=jax.ShapeDtypeStruct((B, D), x.dtype),
            grid_spec=pltpu.PrefetchScalarGridSpec(
                num_scalar_prefetch=0,
                grid=(k_tiles,),
                in_specs=[
                    pl.BlockSpec((B, tk), lambda k: (0, k)),   # x  (matmul operand)
                    pl.BlockSpec((D, tk), lambda k: (0, k)),   # W  [out, in] K-tiles
                    pl.BlockSpec((1, D), lambda k: (0, 0)),    # bias
                    pl.BlockSpec((B, D), lambda k: (0, 0)),    # mask
                    pl.BlockSpec((B, D), lambda k: (0, 0)),    # x  (f32, for gating)
                    pl.BlockSpec((1, D), lambda k: (0, 0)),    # gamma1
                    pl.BlockSpec((1, D), lambda k: (0, 0)),    # gamma2
                    pl.BlockSpec((1, D), lambda k: (0, 0)),    # beta1 + beta2
                ],
                out_specs=pl.BlockSpec((B, D), lambda k: (0, 0)),
                scratch_shapes=[pltpu.VMEM((B, D), jnp.float32)],
            ),
            compiler_params=pltpu.CompilerParams(
                dimension_semantics=("arbitrary",),
                vmem_limit_bytes=32 * 1024 * 1024,
            ),
            cost_estimate=cost,
        )(x_mm, w, b, mask, x, g1, g2, beta_sum)

    # ------- general path: (feature, K) tiled gating kernel + row-normalize kernel -------
    tn = feature_tile if feature_tile is not None else _pick_feature_tile(D, B)
    n_tiles = D // tn

    gated = pl.pallas_call(
        _context_gating_kernel,
        out_shape=jax.ShapeDtypeStruct((B, D), jnp.float32),
        grid_spec=pltpu.PrefetchScalarGridSpec(
            num_scalar_prefetch=0,
            grid=(n_tiles, k_tiles),
            in_specs=[
                pl.BlockSpec((B, tk), lambda n, k: (0, k)),    # x  (matmul operand)
                pl.BlockSpec((tn, tk), lambda n, k: (n, k)),   # W  [out, in] tiles
                pl.BlockSpec((1, tn), lambda n, k: (0, n)),    # bias
                pl.BlockSpec((B, tn), lambda n, k: (0, n)),    # mask
                pl.BlockSpec((B, tn), lambda n, k: (0, n)),    # x  (f32, for gating)
                pl.BlockSpec((1, tn), lambda n, k: (0, n)),    # gamma1
                pl.BlockSpec((1, tn), lambda n, k: (0, n)),    # gamma2
                pl.BlockSpec((1, tn), lambda n, k: (0, n)),    # beta1 + beta2
            ],
            out_specs=pl.BlockSpec((B, tn), lambda n, k: (0, n)),
            scratch_shapes=[pltpu.VMEM((B, tn), jnp.float32)],
        ),
        compiler_params=pltpu.CompilerParams(
            dimension_semantics=("parallel", "arbitrary"),
            vmem_limit_bytes=32 * 1024 * 1024,
        ),
        cost_estimate=cost,
    )(x_mm, w, b, mask, x, g1, g2, beta_sum)

    tb = _pick_batch_tile(B)
    return pl.pallas_call(
        _l2_normalize_kernel,
        out_shape=jax.ShapeDtypeStruct((B, D), x.dtype),
        grid_spec=pltpu.PrefetchScalarGridSpec(
            num_scalar_prefetch=0,
            grid=(B // tb,),
            in_specs=[pl.BlockSpec((tb, D), lambda i: (i, 0))],
            out_specs=pl.BlockSpec((tb, D), lambda i: (i, 0)),
        ),
        compiler_params=pltpu.CompilerParams(
            dimension_semantics=("parallel",),
            vmem_limit_bytes=32 * 1024 * 1024,
        ),
    )(gated)


# ---------------------------------------------------------------------------
# Pure-JAX f32 reference mirroring the PyTorch forward (training-mode BN).
# ---------------------------------------------------------------------------
def _reference(x, mask, params):
    x2 = x @ params["fc_w"].T + params["fc_b"]

    def bn(v, g, b):
        mean = jnp.mean(v, axis=0, keepdims=True)
        var = jnp.mean((v - mean) ** 2, axis=0, keepdims=True)
        return g * (v - mean) / jnp.sqrt(var + _BN_EPS) + b

    t = bn(mask, params["bn1_w"], params["bn1_b"]) + bn(x2, params["bn2_w"], params["bn2_b"])
    gated = x * jax.nn.sigmoid(t)
    norm = jnp.linalg.norm(gated, axis=1, keepdims=True)
    return gated / jnp.maximum(norm, 1e-12)


def _make_case(key, B, D):
    kx, km, kw, kb, k1, k2, k3, k4 = jax.random.split(key, 8)
    x = jax.random.normal(kx, (B, D), dtype=jnp.float32)
    mask = jax.random.normal(km, (B, D), dtype=jnp.float32)
    params = {
        "fc_w": jax.random.normal(kw, (D, D), dtype=jnp.float32) * 0.1,
        "fc_b": jax.random.normal(kb, (D,), dtype=jnp.float32) * 0.1,
        "bn1_w": 1.0 + 0.1 * jax.random.normal(k1, (D,), dtype=jnp.float32),
        "bn1_b": 0.1 * jax.random.normal(k2, (D,), dtype=jnp.float32),
        "bn2_w": 1.0 + 0.1 * jax.random.normal(k3, (D,), dtype=jnp.float32),
        "bn2_b": 0.1 * jax.random.normal(k4, (D,), dtype=jnp.float32),
    }
    return x, mask, params


if __name__ == "__main__":
    # TODO(synk): training-mode BatchNorm running_mean/var buffer updates (a PyTorch side
    # effect, not part of the returned tensor) are not materialized here.
    key = jax.random.PRNGKey(0)
    k_small, k_big = jax.random.split(key)

    # Case 1: small shapes (batch=4, output_dimension=32) -> fully fused single kernel.
    x, mask, params = _make_case(k_small, 4, 32)
    ref = _reference(x, mask, params)
    out_f32 = jax.block_until_ready(
        gated_embedding_unit_reasoning(x, mask, params, matmul_dtype=jnp.float32))
    assert jnp.allclose(out_f32, ref, atol=1e-4, rtol=1e-4), "fused f32-path mismatch"
    out = jax.block_until_ready(gated_embedding_unit_reasoning(x, mask, params))
    assert jnp.allclose(out, ref, atol=2e-2, rtol=2e-2), "fused bf16-path mismatch"

    # Case 2: exercise the tiled (feature x K grid + separate normalize) path.
    x, mask, params = _make_case(k_big, 8, 256)
    ref = _reference(x, mask, params)
    out_f32 = jax.block_until_ready(
        gated_embedding_unit_reasoning(x, mask, params, matmul_dtype=jnp.float32,
                                       allow_fused=False, feature_tile=128))
    assert jnp.allclose(out_f32, ref, atol=1e-3, rtol=1e-3), "tiled f32-path mismatch"
    out = jax.block_until_ready(
        gated_embedding_unit_reasoning(x, mask, params, allow_fused=False, feature_tile=128))
    assert jnp.allclose(out, ref, atol=2e-2, rtol=2e-2), "tiled bf16-path mismatch"

    print("KERNEL_OK")
</pallas_src>

<mosaic_0001>
module attributes {stable_mosaic.version = 11 : i64} {
  func.func @_fused_kernel(%arg0: i32, %arg1: memref<4x32xf32, #tpu.memory_space<vmem>>, %arg2: memref<32x32xf32, #tpu.memory_space<vmem>>, %arg3: memref<1x32xf32, #tpu.memory_space<vmem>>, %arg4: memref<4x32xf32, #tpu.memory_space<vmem>>, %arg5: memref<4x32xf32, #tpu.memory_space<vmem>>, %arg6: memref<1x32xf32, #tpu.memory_space<vmem>>, %arg7: memref<1x32xf32, #tpu.memory_space<vmem>>, %arg8: memref<1x32xf32, #tpu.memory_space<vmem>>, %arg9: memref<4x32xf32, #tpu.memory_space<vmem>>, %arg10: memref<4x32xf32, #tpu.memory_space<vmem>>) attributes {dimension_semantics = [#tpu.dimension_semantics<arbitrary>], iteration_bounds = array<i64: 1>, scalar_prefetch = 0 : i64, scratch_operands = 1 : i64, tpu.core_type = #tpu.core_type<tc>, window_params = [{transform_indices = @transform_0, window_bounds = array<i64: 4, 32>}, {transform_indices = @transform_1, window_bounds = array<i64: 32, 32>}, {pipeline_mode = #tpu.pipeline_mode<synchronous>, transform_indices = @transform_2, window_bounds = array<i64: 1, 32>}, {pipeline_mode = #tpu.pipeline_mode<synchronous>, transform_indices = @transform_3, window_bounds = array<i64: 4, 32>}, {pipeline_mode = #tpu.pipeline_mode<synchronous>, transform_indices = @transform_4, window_bounds = array<i64: 4, 32>}, {pipeline_mode = #tpu.pipeline_mode<synchronous>, transform_indices = @transform_5, window_bounds = array<i64: 1, 32>}, {pipeline_mode = #tpu.pipeline_mode<synchronous>, transform_indices = @transform_6, window_bounds = array<i64: 1, 32>}, {pipeline_mode = #tpu.pipeline_mode<synchronous>, transform_indices = @transform_7, window_bounds = array<i64: 1, 32>}, {pipeline_mode = #tpu.pipeline_mode<synchronous>, transform_indices = @transform_8, window_bounds = array<i64: 4, 32>}]} {
    %c0_i32 = arith.constant 0 : i32
    %0 = arith.cmpi eq, %arg0, %c0_i32 : i32
    %1 = arith.extui %0 : i1 to i32
    %c0_i32_0 = arith.constant 0 : i32
    %2 = arith.cmpi ne, %1, %c0_i32_0 : i32
    scf.if %2 {
      %cst_10 = arith.constant 0.000000e+00 : f32
      %12 = vector.broadcast %cst_10 : f32 to vector<4x32xf32>
      %c0_11 = arith.constant 0 : index
      %c0_12 = arith.constant 0 : index
      %13 = vector.load %arg10[%c0_11, %c0_12] : memref<4x32xf32, #tpu.memory_space<vmem>>, vector<4x32xf32>
      tpu.vector_store %arg10[%c0_11, %c0_12], %12 {strides = array<i32>} : memref<4x32xf32, #tpu.memory_space<vmem>>, vector<4x32xf32>,
    } else {
    }
    %c0 = arith.constant 0 : index
    %c0_1 = arith.constant 0 : index
    %3 = vector.load %arg10[%c0, %c0_1] : memref<4x32xf32, #tpu.memory_space<vmem>>, vector<4x32xf32>
    %c0_2 = arith.constant 0 : index
    %c0_3 = arith.constant 0 : index
    %4 = vector.load %arg1[%c0_2, %c0_3] : memref<4x32xf32, #tpu.memory_space<vmem>>, vector<4x32xf32>
    %c0_4 = arith.constant 0 : index
    %c0_5 = arith.constant 0 : index
    %5 = vector.load %arg2[%c0_4, %c0_5] : memref<32x32xf32, #tpu.memory_space<vmem>>, vector<32x32xf32>
    %cst = arith.constant dense<0.000000e+00> : vector<4x32xf32>
    %6 = tpu.matmul %4, %5, %cst {dimension_numbers = #tpu.dot_dimension_numbers<[1], [1], [0], [0], [0, 0, 1, 0], [], []>} : vector<4x32xf32>, vector<32x32xf32>, vector<4x32xf32> -> vector<4x32xf32>
    %7 = arith.addf %3, %6 : vector<4x32xf32>
    %c0_6 = arith.constant 0 : index
    %c0_7 = arith.constant 0 : index
    %8 = vector.load %arg10[%c0_6, %c0_7] : memref<4x32xf32, #tpu.memory_space<vmem>>, vector<4x32xf32>
    tpu.vector_store %arg10[%c0_6, %c0_7], %7 {strides = array<i32>} : memref<4x32xf32, #tpu.memory_space<vmem>>, vector<4x32xf32>,
    %c0_i32_8 = arith.constant 0 : i32
    %9 = arith.cmpi eq, %arg0, %c0_i32_8 : i32
    %10 = arith.extui %9 : i1 to i32
    %c0_i32_9 = arith.constant 0 : i32
    %11 = arith.cmpi ne, %10, %c0_i32_9 : i32
    scf.if %11 {
      %c0_10 = arith.constant 0 : index
      %c0_11 = arith.constant 0 : index
      %12 = vector.load %arg10[%c0_10, %c0_11] : memref<4x32xf32, #tpu.memory_space<vmem>>, vector<4x32xf32>
      %c0_12 = arith.constant 0 : index
      %c0_13 = arith.constant 0 : index
      %13 = vector.load %arg3[%c0_12, %c0_13] : memref<1x32xf32, #tpu.memory_space<vmem>>, vector<1x32xf32>
      %14 = vector.broadcast %13 : vector<1x32xf32> to vector<4x32xf32>
      %15 = arith.addf %12, %14 : vector<4x32xf32>
      %c0_14 = arith.constant 0 : index
      %c0_15 = arith.constant 0 : index
      %16 = vector.load %arg4[%c0_14, %c0_15] : memref<4x32xf32, #tpu.memory_space<vmem>>, vector<4x32xf32>
      %c0_16 = arith.constant 0 : index
      %c0_17 = arith.constant 0 : index
      %17 = vector.load %arg5[%c0_16, %c0_17] : memref<4x32xf32, #tpu.memory_space<vmem>>, vector<4x32xf32>
      %c0_18 = arith.constant 0 : index
      %c0_19 = arith.constant 0 : index
      %18 = vector.load %arg6[%c0_18, %c0_19] : memref<1x32xf32, #tpu.memory_space<vmem>>, vector<1x32xf32>
      %c0_20 = arith.constant 0 : index
      %c0_21 = arith.constant 0 : index
      %19 = vector.load %arg7[%c0_20, %c0_21] : memref<1x32xf32, #tpu.memory_space<vmem>>, vector<1x32xf32>
      %c0_22 = arith.constant 0 : index
      %c0_23 = arith.constant 0 : index
      %20 = vector.load %arg8[%c0_22, %c0_23] : memref<1x32xf32, #tpu.memory_space<vmem>>, vector<1x32xf32>
      %cst_24 = arith.constant dense<0.000000e+00> : vector<32xf32>
      %21 = vector.multi_reduction <add>, %16, %cst_24 [0] : vector<4x32xf32> to vector<32xf32>
      %22 = vector.shape_cast %21 : vector<32xf32> to vector<1x32xf32>
      %23 = arith.mulf %16, %16 : vector<4x32xf32>
      %cst_25 = arith.constant dense<0.000000e+00> : vector<32xf32>
      %24 = vector.multi_reduction <add>, %23, %cst_25 [0] : vector<4x32xf32> to vector<32xf32>
      %25 = vector.shape_cast %24 : vector<32xf32> to vector<1x32xf32>
      %cst_26 = arith.constant 2.500000e-01 : f32
      %26 = vector.broadcast %cst_26 : f32 to vector<1x32xf32>
      %27 = arith.mulf %22, %26 : vector<1x32xf32>
      %cst_27 = arith.constant 2.500000e-01 : f32
      %28 = vector.broadcast %cst_27 : f32 to vector<1x32xf32>
      %29 = arith.mulf %25, %28 : vector<1x32xf32>
      %30 = arith.mulf %27, %27 : vector<1x32xf32>
      %31 = arith.subf %29, %30 : vector<1x32xf32>
      %cst_28 = arith.constant 0.000000e+00 : f32
      %32 = vector.broadcast %cst_28 : f32 to vector<1x32xf32>
      %33 = arith.maximumf %31, %32 : vector<1x32xf32>
      %cst_29 = arith.constant 9.99999974E-6 : f32
      %34 = vector.broadcast %cst_29 : f32 to vector<1x32xf32>
      %35 = arith.addf %33, %34 : vector<1x32xf32>
      %36 = math.rsqrt %35 : vector<1x32xf32>
      %37 = arith.mulf %18, %36 : vector<1x32xf32>
      %38 = arith.mulf %27, %37 : vector<1x32xf32>
      %cst_30 = arith.constant dense<0.000000e+00> : vector<32xf32>
      %39 = vector.multi_reduction <add>, %15, %cst_30 [0] : vector<4x32xf32> to vector<32xf32>
      %40 = vector.shape_cast %39 : vector<32xf32> to vector<1x32xf32>
      %41 = arith.mulf %15, %15 : vector<4x32xf32>
      %cst_31 = arith.constant dense<0.000000e+00> : vector<32xf32>
      %42 = vector.multi_reduction <add>, %41, %cst_31 [0] : vector<4x32xf32> to vector<32xf32>
      %43 = vector.shape_cast %42 : vector<32xf32> to vector<1x32xf32>
      %cst_32 = arith.constant 2.500000e-01 : f32
      %44 = vector.broadcast %cst_32 : f32 to vector<1x32xf32>
      %45 = arith.mulf %40, %44 : vector<1x32xf32>
      %cst_33 = arith.constant 2.500000e-01 : f32
      %46 = vector.broadcast %cst_33 : f32 to vector<1x32xf32>
      %47 = arith.mulf %43, %46 : vector<1x32xf32>
      %48 = arith.mulf %45, %45 : vector<1x32xf32>
      %49 = arith.subf %47, %48 : vector<1x32xf32>
      %cst_34 = arith.constant 0.000000e+00 : f32
      %50 = vector.broadcast %cst_34 : f32 to vector<1x32xf32>
      %51 = arith.maximumf %49, %50 : vector<1x32xf32>
      %cst_35 = arith.constant 9.99999974E-6 : f32
      %52 = vector.broadcast %cst_35 : f32 to vector<1x32xf32>
      %53 = arith.addf %51, %52 : vector<1x32xf32>
      %54 = math.rsqrt %53 : vector<1x32xf32>
      %55 = arith.mulf %19, %54 : vector<1x32xf32>
      %56 = arith.mulf %45, %55 : vector<1x32xf32>
      %57 = vector.broadcast %37 : vector<1x32xf32> to vector<4x32xf32>
      %58 = arith.mulf %16, %57 : vector<4x32xf32>
      %59 = vector.broadcast %55 : vector<1x32xf32> to vector<4x32xf32>
      %60 = arith.mulf %15, %59 : vector<4x32xf32>
      %61 = arith.addf %58, %60 : vector<4x32xf32>
      %62 = arith.subf %20, %38 : vector<1x32xf32>
      %63 = arith.subf %62, %56 : vector<1x32xf32>
      %64 = vector.broadcast %63 : vector<1x32xf32> to vector<4x32xf32>
      %65 = arith.addf %61, %64 : vector<4x32xf32>
      %66 = arith.negf %65 : vector<4x32xf32>
      %67 = math.exp %66 : vector<4x32xf32>
      %cst_36 = arith.constant 1.000000e+00 : f32
      %68 = vector.broadcast %cst_36 : f32 to vector<4x32xf32>
      %69 = arith.addf %68, %67 : vector<4x32xf32>
      %70 = arith.divf %68, %69 : vector<4x32xf32>
      %71 = arith.mulf %17, %70 : vector<4x32xf32>
      %72 = arith.mulf %71, %71 : vector<4x32xf32>
      %cst_37 = arith.constant dense<0.000000e+00> : vector<4xf32>
      %73 = vector.multi_reduction <add>, %72, %cst_37 [1] : vector<4x32xf32> to vector<4xf32>
      %74 = vector.shape_cast %73 : vector<4xf32> to vector<4x1xf32>
      %cst_38 = arith.constant 1.000000e-24 : f32
      %75 = vector.broadcast %cst_38 : f32 to vector<4x1xf32>
      %76 = arith.maximumf %74, %75 : vector<4x1xf32>
      %77 = math.rsqrt %76 : vector<4x1xf32>
      %78 = vector.broadcast %77 : vector<4x1xf32> to vector<4x32xf32>
      %79 = arith.mulf %71, %78 : vector<4x32xf32>
      %c0_39 = arith.constant 0 : index
      %c0_40 = arith.constant 0 : index
      %80 = vector.load %arg9[%c0_39, %c0_40] : memref<4x32xf32, #tpu.memory_space<vmem>>, vector<4x32xf32>
      tpu.vector_store %arg9[%c0_39, %c0_40], %79 {strides = array<i32>} : memref<4x32xf32, #tpu.memory_space<vmem>>, vector<4x32xf32>,
    } else {
    }
    return
  }
  func.func @transform_0(%arg0: i32) -> (i32, i32) {
    %c0_i32 = arith.constant 0 : i32
    %c0_i32_0 = arith.constant 0 : i32
    return %c0_i32, %arg0 : i32, i32
  }
  func.func @transform_1(%arg0: i32) -> (i32, i32) {
    %c0_i32 = arith.constant 0 : i32
    %c0_i32_0 = arith.constant 0 : i32
    return %c0_i32, %arg0 : i32, i32
  }
  func.func @transform_2(%arg0: i32) -> (i32, i32) {
    %c0_i32 = arith.constant 0 : i32
    %c0_i32_0 = arith.constant 0 : i32
    %c0_i32_1 = arith.constant 0 : i32
    return %c0_i32, %c0_i32_0 : i32, i32
  }
  func.func @transform_3(%arg0: i32) -> (i32, i32) {
    %c0_i32 = arith.constant 0 : i32
    %c0_i32_0 = arith.constant 0 : i32
    %c0_i32_1 = arith.constant 0 : i32
    return %c0_i32, %c0_i32_0 : i32, i32
  }
  func.func @transform_4(%arg0: i32) -> (i32, i32) {
    %c0_i32 = arith.constant 0 : i32
    %c0_i32_0 = arith.constant 0 : i32
    %c0_i32_1 = arith.constant 0 : i32
    return %c0_i32, %c0_i32_0 : i32, i32
  }
  func.func @transform_5(%arg0: i32) -> (i32, i32) {
    %c0_i32 = arith.constant 0 : i32
    %c0_i32_0 = arith.constant 0 : i32
    %c0_i32_1 = arith.constant 0 : i32
    return %c0_i32, %c0_i32_0 : i32, i32
  }
  func.func @transform_6(%arg0: i32) -> (i32, i32) {
    %c0_i32 = arith.constant 0 : i32
    %c0_i32_0 = arith.constant 0 : i32
    %c0_i32_1 = arith.constant 0 : i32
    return %c0_i32, %c0_i32_0 : i32, i32
  }
  func.func @transform_7(%arg0: i32) -> (i32, i32) {
    %c0_i32 = arith.constant 0 : i32
    %c0_i32_0 = arith.constant 0 : i32
    %c0_i32_1 = arith.constant 0 : i32
    return %c0_i32, %c0_i32_0 : i32, i32
  }
  func.func @transform_8(%arg0: i32) -> (i32, i32) {
    %c0_i32 = arith.constant 0 : i32
    %c0_i32_0 = arith.constant 0 : i32
    %c0_i32_1 = arith.constant 0 : i32
    return %c0_i32, %c0_i32_0 : i32, i32
  }
}

</mosaic_0001>

<bundles_post_ra>
// kernel: tpu_custom_call.1
= control target key start
LH: loop header
LB: loop body
LE: loop exit
PB: predicated region body
PF: predicated region fallthrough
CT: control target
= control target key end

     0   :  { %13 = vsyncpa [#allocation4], 0  ;;  %s509_s0 = inlined_call_operand.hbm [shape: f32[4,32], index: 0, kind: input, shape index: {}]   ;;  %s510_s1 = inlined_call_operand.hbm [shape: f32[32,32], index: 1, kind: input, shape index: {}]   ;;  %s511_s2 = inlined_call_operand.vmem [shape: f32[1,32], index: 2, kind: input, shape index: {}]   ;;  %s512_s3 = inlined_call_operand.vmem [shape: f32[4,32], index: 3, kind: input, shape index: {}]   ;;  %s513_s4 = inlined_call_operand.hbm [shape: f32[4,32], index: 4, kind: input, shape index: {}]   ;;  %s514_s5 = inlined_call_operand.vmem [shape: f32[1,32], index: 5, kind: input, shape index: {}]   ;;  %s515_s6 = inlined_call_operand.vmem [shape: f32[1,32], index: 6, kind: input, shape index: {}]   ;;  %s516_s7 = inlined_call_operand.vmem [shape: f32[1,32], index: 7, kind: input, shape index: {}]   ;;  %s517_s8 = inlined_call_operand.hbm [shape: f32[4,32], index: 8, kind: output, shape index: {}]  }
   0x1   :  { %14 = vsyncpa [#allocation7], 0 }
   0x2   :  { %15 = vsyncpa [#allocation5], 0  ;;  %s415_s27 = smov [#allocation6]  }
   0x3   :  { %s31_s28 = sshll.u32 %s415_s27, 4  ;;  %s32_s28 = int_to_ptr.vmem [resolvable:$true] %s31_s28 }
   0x4   :  { %s337_s29 = scalar_lea.vmem %s32_s28, 512  ;;  %p342_p1 = scmp.lt.s32.totalorder %s32_s28, %s32_s28 }
   0x5   :  { %p338_p0 = scmp.ne.s32.totalorder %s32_s28, %s337_s29  ;;  %p343_p2 = scmp.lt.s32.totalorder %s337_s29, %s337_s29 }
   0x7   :  { %p344_p3 = por %p343_p2, %p342_p1 }
   0x9   :  { %p345_p4 = pnand %p344_p3, %p338_p0 }
   0xb   :  { %348 = shalt.err (!%p345_p4)
}
   0xc   :  { %s416_s30 = smov 128   ;;  %s417_s9 = smov 8  }
   0xd   :  { %37 = dma.hbm_to_vmem [thread:$0]  %s510_s1, 512, %s32_s28, [#allocation7], %s416_s30, %s416_s30, %s417_s9  }
   0xe   :  { %s418_s12 = smov [#allocation3]   ;;  %s419_s14 = smov [#allocation8]  }
   0xf   :  { %s22_s13 = sshll.u32 %s418_s12, 4  ;;  %s48_s15 = sshll.u32 %s419_s14, 4  ;;  %s23_s13 = int_to_ptr.vmem [resolvable:$true] %s22_s13  ;;  %s49_s15 = int_to_ptr.vmem [resolvable:$true] %s48_s15 }
  0x10   :  { %s357_s16 = scalar_lea.vmem %s23_s13, 64  ;;  %p362_p6 = scmp.lt.s32.totalorder %s23_s13, %s23_s13 }
  0x11   :  { %p358_p5 = scmp.ne.s32.totalorder %s23_s13, %s357_s16  ;;  %p363_p7 = scmp.lt.s32.totalorder %s357_s16, %s357_s16 }
  0x13   :  { %p364_p8 = por %p363_p7, %p362_p6 }
  0x15   :  { %p365_p9 = pnand %p364_p8, %p358_p5 }
  0x17   :  { %368 = shalt.err (!%p365_p9)
}
  0x18   :  { %25 = dma.hbm_to_vmem [thread:$0]  %s509_s0, 64, %s23_s13, [#allocation4]  }
  0x19   :  { %s377_s19 = scalar_lea.vmem %s49_s15, 64  ;;  %p382_p11 = scmp.lt.s32.totalorder %s49_s15, %s49_s15 }
  0x1a   :  { %p378_p10 = scmp.ne.s32.totalorder %s49_s15, %s377_s19  ;;  %p383_p12 = scmp.lt.s32.totalorder %s377_s19, %s377_s19 }
  0x1c   :  { %p384_p13 = por %p383_p12, %p382_p11 }
  0x1e   :  { %p385_p0 = pnand %p384_p13, %p378_p10 }
  0x20   :  { %388 = shalt.err (!%p385_p0)
}
  0x21   :  { %51 = dma.hbm_to_vmem [thread:$0]  %s513_s4, 64, %s49_s15, [#allocation7]  }
  0x22   :  { %409 = dma.done.wait [#allocation4], 64  }
  0x23   :  { %410 = vsyncadd [#allocation4], 4294967232 }
  0x24   :  { %411 = dma.done.wait [#allocation7], 576  }
  0x25   :  { %412 = vsyncadd [#allocation7], 4294966720  ;;  %vm71_vm0 = vcmask 257024   ;;  %v420_v0 = vmov 0.0   ;;  %vm421_vm1 = vmmov 0   ;;  %vm79_vm2 = vcmask 261120  }
  0x26   :  { %300 = vmatprep.subr.mxu0 %v420_v0  ;;  %308 = vmatprep.mubr.msk.f32.mxu0 %vm421_vm1, %v420_v0  ;;  %72 = vst.msk [vmem:[#allocation2] sm:$0xf] %vm71_vm0, %v420_v0  ;;  %v78_v1 = vld [vmem:[#allocation6 + $0x18] sm:$0xff]  ;;  %v77_v2 = vld [vmem:[#allocation6 + $0x10] sm:$0xff]  ;;  %v76_v3 = vld [vmem:[#allocation6 + $0x8] sm:$0xff]  ;;  %v234_v56 = vlaneseq }
  0x27   :  { %301 = vmatpush3.xpose.msk.msra.mxu0 %vm79_vm2, %v78_v1  ;;  %v75_v4 = vld [vmem:[#allocation6] sm:$0xff]  ;;  %v74_v5 = vld [vmem:[#allocation3] sm:$0xf]  ;;  %v481_v6 = vld [vmem:[%s512_s3] sm:$0xf] }
  0x28   :  { %302 = vmatprep.subr.mxu0 %v420_v0  ;;  %v185_v7 = vsel %vm71_vm0, %v481_v6, 0.0  ;;  %v192_v8 = vmul.f32 %v481_v6, %v481_v6  ;;  %v293_v27 = vld [vmem:[%s511_s2] ss:$0 sm:$0xff]  ;;  %v235_v59 = vshrl.u32 %v234_v56, 7 }
  0x29   :  { %v186_v9 = vrot.slane %v185_v7, 4  ;;  %v182_v58 = vld [vmem:[%s514_s5] sm:$0x1]  ;;  %s422_s5 = smov [#allocation9]  }
  0x2a   :  { %v193_v10 = vsel %vm71_vm0, %v192_v8, 0.0  ;;  %v236_v61 = vsub.s32 0, %v235_v59  ;;  %v183_v63 = vld [vmem:[%s515_s6] sm:$0x1]  ;;  %s278_s6 = sshll.u32 %s422_s5, 4  ;;  %s279_s6 = int_to_ptr.vmem [resolvable:$true] %s278_s6 }
  0x2b   :  { %303 = vmatpush3.xpose.msk.msra.mxu0 %vm79_vm2, %v77_v2  ;;  %v187_v11 = vadd.f32 %v186_v9, %v185_v7  ;;  %v194_v12 = vrot.slane %v193_v10, 4  ;;  %p394_p2 = scmp.lt.s32.totalorder %s279_s6, %s279_s6 }
  0x2c   :  { %304 = vmatprep.subr.mxu0 %v420_v0 }
  0x2d   :  { %v188_v13 = vrot.slane %v187_v11, 2  ;;  %v195_v14 = vadd.f32 %v194_v12, %v193_v10  ;;  %v73_v17 = vld [vmem:[#allocation2] sm:$0xf] }
  0x2f   :  { %305 = vmatpush3.xpose.msk.msra.mxu0 %vm79_vm2, %v76_v3  ;;  %v189_v15 = vadd.f32 %v188_v13, %v187_v11  ;;  %v196_v16 = vrot.slane %v195_v14, 2 }
  0x30   :  { %306 = vmatprep.subr.mxu0 %v420_v0  ;;  %v184_v0 = vld [vmem:[%s516_s7] sm:$0x1]  ;;  %s389_s7 = scalar_lea.vmem %s279_s6, 64 }
  0x31   :  { %v190_v18 = vrot.slane %v189_v15, 1  ;;  %v197_v19 = vadd.f32 %v196_v16, %v195_v14  ;;  %p390_p1 = scmp.ne.s32.totalorder %s279_s6, %s389_s7  ;;  %p395_p3 = scmp.lt.s32.totalorder %s389_s7, %s389_s7 }
  0x33   :  { %307 = vmatpush3.xpose.msk.msra.mxu0 %vm79_vm2, %v75_v4  ;;  %v191_v23 = vadd.f32 %v190_v18, %v189_v15  ;;  %v198_v24 = vrot.slane %v197_v19, 1  ;;  %p396_p4 = por %p395_p3, %p394_p2 }
  0x35   :  { %v199_v25 = vadd.f32 %v198_v24, %v197_v19  ;;  %v200_v26 = vmul.f32 0.25, %v191_v23  ;;  %p397_p5 = pnand %p396_p4, %p390_p1 }
  0x36   :  { %309 = vmatmul.mubr.msk.f32.vlgmr.msra.gmra.mxu0 %vm79_vm2, %v74_v5 }
  0x37   :  { %v201_v29 = vmul.f32 0.25, %v199_v25  ;;  %v202_v30 = vmul.f32 %v200_v26, %v200_v26 }
  0x39   :  { %v203_v34 = vsub.f32 %v201_v29, %v202_v30 }
  0x3b   :  { %v204_v39 = vmax.f32 %v203_v34, 0.0 }
  0x3d   :  { %v205_v44 = vadd.f32 1e-05, %v204_v39 }
  0x3f   :  { %319 = vrsqrt.f32 %v205_v44 }
  0x4c   :  { %v320_v57 = vpop.eup %319 }
  0x4d   :  { %v207_v60 = vmul.f32 %v320_v57, %v182_v58 }
  0x4f   :  { %v208_v62 = vmul.f32 %v207_v60, %v200_v26  ;;  %v237_v1 = vrot.slane %v207_v60, %v236_v61 }
  0x51   :  { %v248_v4 = vsub.f32 %v184_v0, %v208_v62  ;;  %v239_v7 = vmul.f32 %v237_v1, %v481_v6 }
  0xf6   :  { %v161_v20 = vpop.f32.mrf.mxu0 }
  0xf7   :  { %v165_v21 = vadd.f32 %v161_v20, %v73_v17  ;;  %v181_v17 = vld [vmem:[#allocation8] sm:$0xf] }
  0xf8   :  { %v310_v22 = vpop.f32.mrf.mxu0 }
  0xf9   :  { %167 = vst.msk [vmem:[#allocation2] sm:$0xf] %vm71_vm0, %v165_v21 }
 0x100   :  { %v171_v28 = vld [vmem:[#allocation2] sm:$0xf] }
 0x101   :  { %v179_v31 = vadd.f32 %v293_v27, %v171_v28 }
 0x103   :  { %v209_v32 = vsel %vm71_vm0, %v179_v31, 0.0  ;;  %v216_v33 = vmul.f32 %v179_v31, %v179_v31 }
 0x104   :  { %v210_v35 = vrot.slane %v209_v32, 4 }
 0x105   :  { %v217_v36 = vsel %vm71_vm0, %v216_v33, 0.0 }
 0x106   :  { %v211_v37 = vadd.f32 %v210_v35, %v209_v32  ;;  %v218_v38 = vrot.slane %v217_v36, 4 }
 0x108   :  { %v212_v40 = vrot.slane %v211_v37, 2  ;;  %v219_v41 = vadd.f32 %v218_v38, %v217_v36 }
 0x10a   :  { %v213_v42 = vadd.f32 %v212_v40, %v211_v37  ;;  %v220_v43 = vrot.slane %v219_v41, 2 }
 0x10c   :  { %v214_v45 = vrot.slane %v213_v42, 1  ;;  %v221_v46 = vadd.f32 %v220_v43, %v219_v41 }
 0x10e   :  { %v215_v47 = vadd.f32 %v214_v45, %v213_v42  ;;  %v222_v48 = vrot.slane %v221_v46, 1 }
 0x110   :  { %v223_v49 = vadd.f32 %v222_v48, %v221_v46  ;;  %v224_v50 = vmul.f32 0.25, %v215_v47 }
 0x112   :  { %v225_v51 = vmul.f32 0.25, %v223_v49  ;;  %v226_v52 = vmul.f32 %v224_v50, %v224_v50 }
 0x114   :  { %v227_v53 = vsub.f32 %v225_v51, %v226_v52 }
 0x116   :  { %v228_v54 = vmax.f32 %v227_v53, 0.0 }
 0x118   :  { %v229_v55 = vadd.f32 1e-05, %v228_v54 }
 0x11a   :  { %321 = vrsqrt.f32 %v229_v55 }
 0x127   :  { %v322_v2 = vpop.eup %321 }
 0x128   :  { %v231_v3 = vmul.f32 %v322_v2, %v183_v63 }
 0x12a   :  { %v232_v5 = vmul.f32 %v231_v3, %v224_v50  ;;  %v244_v8 = vrot.slane %v231_v3, %v236_v61 }
 0x12c   :  { %v246_v9 = vmul.f32 %v244_v8, %v179_v31  ;;  %v249_v10 = vsub.f32 %v248_v4, %v232_v5 }
 0x12e   :  { %v247_v11 = vadd.f32 %v246_v9, %v239_v7  ;;  %v254_v12 = vrot.slane %v249_v10, %v236_v61 }
 0x130   :  { %v256_v13 = vadd.f32 %v254_v12, %v247_v11 }
 0x132   :  { %v294_v14 = vmul.f32 -1.442695, %v256_v13 }
 0x134   :  { %323 = vpow2.f32 %v294_v14 }
 0x141   :  { %v324_v15 = vpop.eup %323 }
 0x142   :  { %v260_v16 = vadd.f32 1.0, %v324_v15 }
 0x144   :  { %325 = vrcp.f32 %v260_v16 }
 0x151   :  { %v326_v18 = vpop.eup %325 }
 0x152   :  { %v263_v19 = vmul.f32 %v326_v18, %v181_v17 }
 0x154   :  { %v264_v20 = vmul.f32 %v263_v19, %v263_v19 }
 0x156   :  { %v265_v21 = vsel %vm71_vm0, %v264_v20, 0.0 }
 0x157   :  { %266 = vadd.xlane.f32.xlu0 %v265_v21 }
 0x1e0   :  { %v267_v22 = vpop.xlane.xlu0 %266 }
 0x1e1   :  { %v268_v6 = vmax.f32 %v267_v22, 1e-24 }
 0x1e3   :  { %327 = vrsqrt.f32 %v268_v6 }
 0x1f0   :  { %v328_v23 = vpop.eup %327 }
 0x1f1   :  { %v270_v24 = vmul.f32 %v328_v23, %v263_v19 }
 0x1f3   :  { %271 = vst.msk [vmem:[#allocation9] sm:$0xf] %vm71_vm0, %v270_v24 }
 0x1f4   :  { %400 = shalt.err (!%p397_p5)
}
 0x1f5   :  { %281 = dma.vmem_to_hbm [thread:$0]  %s279_s6, 64, %s517_s8, [#allocation5]  }
 0x1f6   :  { %413 = dma.done.wait [#allocation5], 64  }
 0x1f7   :  { %414 = vsyncadd [#allocation5], 4294967232 }
 0x1f8   :  { %285 = vsyncpa [#allocation4], 1 }
 0x1f9   :  { %286 = vsyncpa [#allocation7], 1 }
 0x1fa   :  { %287 = vsyncpa [#allocation5], 1 }

</bundles_post_ra>
